<compile_context>
chip_gen: v7x
topology: tpu7x:2x2x1
jax: 0.10.0
libtpu: 0.0.40
codegen_flags: <defaults>
</compile_context>

<pallas_src>
import jax
import jax.numpy as jnp
from jax.experimental import pallas as pl
from jax.experimental.pallas import tpu as pltpu


def critic_kernel(state_ref, action_ref, w1s_ref, w1a_ref, b1_ref,
                  w2_ref, b2_ref, w3_ref, b3_ref, o_ref):
    """One batch tile: fused concat-matmul, 3-layer MLP, f32 accumulation."""
    cdt = w1s_ref.dtype  # MXU operand dtype (bf16); activations cast per-dot.

    s = state_ref[...].astype(cdt)
    a = action_ref[...].astype(cdt)

    # linear1 over the concatenated features, without materializing the concat.
    h1 = (jnp.dot(s, w1s_ref[...], preferred_element_type=jnp.float32)
          + jnp.dot(a, w1a_ref[...], preferred_element_type=jnp.float32)
          + b1_ref[...])
    h1 = jnp.maximum(h1, 0.0)                                   # ReLU (f32, VPU)

    h2 = (jnp.dot(h1.astype(cdt), w2_ref[...], preferred_element_type=jnp.float32)
          + b2_ref[...])
    h2 = jnp.maximum(h2, 0.0)                                   # ReLU (f32, VPU)

    out = (jnp.dot(h2.astype(cdt), w3_ref[...], preferred_element_type=jnp.float32)
           + b3_ref[0, 0])                                      # scalar bias from SMEM
    # NOTE: last-dim-1 output => masked stores; lane-dense (1, batch) layout only
    # pays off at very large batch, so keep the natural (batch, 1) layout here.
    o_ref[...] = out.astype(o_ref.dtype)


def _round_up(x, m):
    return ((x + m - 1) // m) * m


def critic_forward(state, action, params, tile_batch=256):
    """Equivalent of Critic.forward: cat([state, action], 1) -> 3-layer MLP."""
    w1s, w1a, b1, w2, b2, w3, b3 = params
    batch, state_dim = state.shape
    action_dim = action.shape[1]
    hidden = w2.shape[0]
    out_dim = w3.shape[1]

    # Batch tile: multiple of 8 (sublane), capped by requested tile_batch.
    tb = _round_up(min(tile_batch, _round_up(batch, 8)), 8)
    padded = _round_up(batch, tb)
    if padded != batch:
        state = jnp.pad(state, ((0, padded - batch), (0, 0)))
        action = jnp.pad(action, ((0, padded - batch), (0, 0)))
    grid = (padded // tb,)

    def batch_spec(feat):
        return pl.BlockSpec((tb, feat), lambda i: (i, 0))

    def resident_spec(arr):  # full array, same block every step -> stays in VMEM
        return pl.BlockSpec(arr.shape, lambda i: (0, 0))

    cost = pl.CostEstimate(
        flops=2 * padded * ((state_dim + action_dim) * hidden
                            + hidden * hidden + hidden * out_dim),
        transcendentals=0,
        bytes_accessed=int(sum(int(a.size) * a.dtype.itemsize for a in
                               (state, action, w1s, w1a, b1, w2, b2, w3, b3))
                           + padded * out_dim * 4),
    )

    out = pl.pallas_call(
        critic_kernel,
        out_shape=jax.ShapeDtypeStruct((padded, out_dim), jnp.float32),
        grid=grid,
        in_specs=[
            batch_spec(state_dim),                 # state tile
            batch_spec(action_dim),                # action tile
            resident_spec(w1s),                    # weights: DMA once, stay resident
            resident_spec(w1a),
            resident_spec(b1),
            resident_spec(w2),
            resident_spec(b2),
            resident_spec(w3),
            pl.BlockSpec((1, 1), lambda i: (0, 0), memory_space=pltpu.SMEM),  # b3 scalar
        ],
        out_specs=pl.BlockSpec((tb, out_dim), lambda i: (i, 0)),
        compiler_params=pltpu.CompilerParams(
            dimension_semantics=("parallel",)),    # v7x: shard batch tiles over 2 TCs
        cost_estimate=cost,
    )(state, action, w1s, w1a, b1, w2, b2, w3, b3)

    return out[:batch]


def init_critic_params(key, state_dim, action_dim, hidden_size, output_size,
                       weight_dtype=jnp.bfloat16):
    """nn.Linear-style init (uniform +/- 1/sqrt(fan_in)); weights bf16, biases f32.

    w1 is drawn over the full concatenated fan_in and then split at the
    state/action boundary so the kernel never needs a host-side concat.
    """
    input_size = state_dim + action_dim
    if input_size == 177:      # replicate the module's __init__ quirk
        input_size = 179
    # TODO(synk): if the 177->179 quirk fires, PyTorch's own forward would
    # shape-error (177-col input into a 179-in linear); here the 2 extra weight
    # rows are simply unused (== zero-padding the concatenated input).

    def linear(k, fan_in, fan_out):
        kw, kb = jax.random.split(k)
        bound = 1.0 / float(fan_in) ** 0.5
        w = jax.random.uniform(kw, (fan_in, fan_out), jnp.float32, -bound, bound)
        b = jax.random.uniform(kb, (1, fan_out), jnp.float32, -bound, bound)
        return w.astype(weight_dtype), b           # stored [in, out] for x @ W

    k1, k2, k3 = jax.random.split(key, 3)
    w1, b1 = linear(k1, input_size, hidden_size)
    w2, b2 = linear(k2, hidden_size, hidden_size)
    w3, b3 = linear(k3, hidden_size, output_size)

    w1s = w1[:state_dim]                                    # static split
    w1a = w1[state_dim:state_dim + action_dim]
    return (w1s, w1a, b1, w2, b2, w3, b3)


if __name__ == "__main__":
    key = jax.random.PRNGKey(0)
    k_params, k_state, k_action = jax.random.split(key, 3)

    batch = 64
    state_dim, action_dim = 20, 12
    hidden_size = 32
    output_size = 1

    params = init_critic_params(k_params, state_dim, action_dim,
                                hidden_size, output_size)
    state = jax.random.normal(k_state, (batch, state_dim), jnp.float32)
    action = jax.random.normal(k_action, (batch, action_dim), jnp.float32)

    # Small tile so the demo actually exercises a multi-step grid (grid=(4,)).
    fwd = jax.jit(lambda s, a: critic_forward(s, a, params, tile_batch=16))
    out = fwd(state, action)
    jax.block_until_ready(out)

    # Pure-JAX reference mirroring the kernel math (bf16 operands, f32 accum).
    w1s, w1a, b1, w2, b2, w3, b3 = params
    cdt = w1s.dtype

    def mm(a, w):
        return jnp.dot(a.astype(cdt), w, preferred_element_type=jnp.float32)

    h1 = jnp.maximum(mm(state, w1s) + mm(action, w1a) + b1, 0.0)
    h2 = jnp.maximum(mm(h1, w2) + b2, 0.0)
    ref = mm(h2, w3) + b3

    assert out.shape == (batch, output_size)
    assert jnp.allclose(out, ref, atol=5e-3, rtol=5e-3), \
        float(jnp.max(jnp.abs(out - ref)))

    print("KERNEL_OK")
</pallas_src>

<mosaic_0001>
module attributes {stable_mosaic.version = 11 : i64} {
  func.func @critic_kernel(%arg0: i32, %arg1: memref<16x20xf32, #tpu.memory_space<vmem>>, %arg2: memref<16x12xf32, #tpu.memory_space<vmem>>, %arg3: memref<20x32xbf16, #tpu.memory_space<vmem>>, %arg4: memref<12x32xbf16, #tpu.memory_space<vmem>>, %arg5: memref<1x32xf32, #tpu.memory_space<vmem>>, %arg6: memref<32x32xbf16, #tpu.memory_space<vmem>>, %arg7: memref<1x32xf32, #tpu.memory_space<vmem>>, %arg8: memref<32x1xbf16, #tpu.memory_space<vmem>>, %arg9: memref<1x1xf32, #tpu.memory_space<smem>>, %arg10: memref<16x1xf32, #tpu.memory_space<vmem>>) attributes {dimension_semantics = [#tpu.dimension_semantics<parallel>], iteration_bounds = array<i64: 4>, scalar_prefetch = 0 : i64, scratch_operands = 0 : i64, tpu.core_type = #tpu.core_type<tc>, window_params = [{transform_indices = @transform_0, window_bounds = array<i64: 16, 20>}, {transform_indices = @transform_1, window_bounds = array<i64: 16, 12>}, {pipeline_mode = #tpu.pipeline_mode<synchronous>, transform_indices = @transform_2, window_bounds = array<i64: 20, 32>}, {pipeline_mode = #tpu.pipeline_mode<synchronous>, transform_indices = @transform_3, window_bounds = array<i64: 12, 32>}, {pipeline_mode = #tpu.pipeline_mode<synchronous>, transform_indices = @transform_4, window_bounds = array<i64: 1, 32>}, {pipeline_mode = #tpu.pipeline_mode<synchronous>, transform_indices = @transform_5, window_bounds = array<i64: 32, 32>}, {pipeline_mode = #tpu.pipeline_mode<synchronous>, transform_indices = @transform_6, window_bounds = array<i64: 1, 32>}, {pipeline_mode = #tpu.pipeline_mode<synchronous>, transform_indices = @transform_7, window_bounds = array<i64: 32, 1>}, {transform_indices = @transform_8, window_bounds = array<i64: 1, 1>}, {transform_indices = @transform_9, window_bounds = array<i64: 16, 1>}]} {
    %c0 = arith.constant 0 : index
    %c0_0 = arith.constant 0 : index
    %0 = vector.load %arg1[%c0, %c0_0] : memref<16x20xf32, #tpu.memory_space<vmem>>, vector<16x20xf32>
    %1 = arith.truncf %0 : vector<16x20xf32> to vector<16x20xbf16>
    %c0_1 = arith.constant 0 : index
    %c0_2 = arith.constant 0 : index
    %2 = vector.load %arg2[%c0_1, %c0_2] : memref<16x12xf32, #tpu.memory_space<vmem>>, vector<16x12xf32>
    %3 = arith.truncf %2 : vector<16x12xf32> to vector<16x12xbf16>
    %c0_3 = arith.constant 0 : index
    %c0_4 = arith.constant 0 : index
    %4 = vector.load %arg3[%c0_3, %c0_4] : memref<20x32xbf16, #tpu.memory_space<vmem>>, vector<20x32xbf16>
    %cst = arith.constant dense<0.000000e+00> : vector<16x32xf32>
    %5 = tpu.matmul %1, %4, %cst {dimension_numbers = #tpu.dot_dimension_numbers<[1], [0], [0], [1], [0, 0, 1, 1], [], []>} : vector<16x20xbf16>, vector<20x32xbf16>, vector<16x32xf32> -> vector<16x32xf32>
    %c0_5 = arith.constant 0 : index
    %c0_6 = arith.constant 0 : index
    %6 = vector.load %arg4[%c0_5, %c0_6] : memref<12x32xbf16, #tpu.memory_space<vmem>>, vector<12x32xbf16>
    %cst_7 = arith.constant dense<0.000000e+00> : vector<16x32xf32>
    %7 = tpu.matmul %3, %6, %cst_7 {dimension_numbers = #tpu.dot_dimension_numbers<[1], [0], [0], [1], [0, 0, 1, 1], [], []>} : vector<16x12xbf16>, vector<12x32xbf16>, vector<16x32xf32> -> vector<16x32xf32>
    %8 = arith.addf %5, %7 : vector<16x32xf32>
    %c0_8 = arith.constant 0 : index
    %c0_9 = arith.constant 0 : index
    %9 = vector.load %arg5[%c0_8, %c0_9] : memref<1x32xf32, #tpu.memory_space<vmem>>, vector<1x32xf32>
    %10 = vector.broadcast %9 : vector<1x32xf32> to vector<16x32xf32>
    %11 = arith.addf %8, %10 : vector<16x32xf32>
    %cst_10 = arith.constant 0.000000e+00 : f32
    %12 = vector.broadcast %cst_10 : f32 to vector<16x32xf32>
    %13 = arith.maximumf %11, %12 : vector<16x32xf32>
    %14 = arith.truncf %13 : vector<16x32xf32> to vector<16x32xbf16>
    %c0_11 = arith.constant 0 : index
    %c0_12 = arith.constant 0 : index
    %15 = vector.load %arg6[%c0_11, %c0_12] : memref<32x32xbf16, #tpu.memory_space<vmem>>, vector<32x32xbf16>
    %cst_13 = arith.constant dense<0.000000e+00> : vector<16x32xf32>
    %16 = tpu.matmul %14, %15, %cst_13 {dimension_numbers = #tpu.dot_dimension_numbers<[1], [0], [0], [1], [0, 0, 1, 1], [], []>} : vector<16x32xbf16>, vector<32x32xbf16>, vector<16x32xf32> -> vector<16x32xf32>
    %c0_14 = arith.constant 0 : index
    %c0_15 = arith.constant 0 : index
    %17 = vector.load %arg7[%c0_14, %c0_15] : memref<1x32xf32, #tpu.memory_space<vmem>>, vector<1x32xf32>
    %18 = vector.broadcast %17 : vector<1x32xf32> to vector<16x32xf32>
    %19 = arith.addf %16, %18 : vector<16x32xf32>
    %cst_16 = arith.constant 0.000000e+00 : f32
    %20 = vector.broadcast %cst_16 : f32 to vector<16x32xf32>
    %21 = arith.maximumf %19, %20 : vector<16x32xf32>
    %22 = arith.truncf %21 : vector<16x32xf32> to vector<16x32xbf16>
    %c0_17 = arith.constant 0 : index
    %c0_18 = arith.constant 0 : index
    %23 = vector.load %arg8[%c0_17, %c0_18] : memref<32x1xbf16, #tpu.memory_space<vmem>>, vector<32x1xbf16>
    %cst_19 = arith.constant dense<0.000000e+00> : vector<16x1xf32>
    %24 = tpu.matmul %22, %23, %cst_19 {dimension_numbers = #tpu.dot_dimension_numbers<[1], [0], [0], [1], [0, 0, 1, 1], [], []>} : vector<16x32xbf16>, vector<32x1xbf16>, vector<16x1xf32> -> vector<16x1xf32>
    %c0_20 = arith.constant 0 : index
    %c0_21 = arith.constant 0 : index
    %25 = memref.load %arg9[%c0_20, %c0_21] : memref<1x1xf32, #tpu.memory_space<smem>>
    %26 = vector.broadcast %25 : f32 to vector<16x1xf32>
    %27 = arith.addf %24, %26 : vector<16x1xf32>
    %c0_22 = arith.constant 0 : index
    %c0_23 = arith.constant 0 : index
    %28 = vector.load %arg10[%c0_22, %c0_23] : memref<16x1xf32, #tpu.memory_space<vmem>>, vector<16x1xf32>
    tpu.vector_store %arg10[%c0_22, %c0_23], %27 {strides = array<i32>} : memref<16x1xf32, #tpu.memory_space<vmem>>, vector<16x1xf32>,
    return
  }
  func.func @transform_0(%arg0: i32) -> (i32, i32) {
    %c0_i32 = arith.constant 0 : i32
    %c0_i32_0 = arith.constant 0 : i32
    return %arg0, %c0_i32 : i32, i32
  }
  func.func @transform_1(%arg0: i32) -> (i32, i32) {
    %c0_i32 = arith.constant 0 : i32
    %c0_i32_0 = arith.constant 0 : i32
    return %arg0, %c0_i32 : i32, i32
  }
  func.func @transform_2(%arg0: i32) -> (i32, i32) {
    %c0_i32 = arith.constant 0 : i32
    %c0_i32_0 = arith.constant 0 : i32
    %c0_i32_1 = arith.constant 0 : i32
    return %c0_i32, %c0_i32_0 : i32, i32
  }
  func.func @transform_3(%arg0: i32) -> (i32, i32) {
    %c0_i32 = arith.constant 0 : i32
    %c0_i32_0 = arith.constant 0 : i32
    %c0_i32_1 = arith.constant 0 : i32
    return %c0_i32, %c0_i32_0 : i32, i32
  }
  func.func @transform_4(%arg0: i32) -> (i32, i32) {
    %c0_i32 = arith.constant 0 : i32
    %c0_i32_0 = arith.constant 0 : i32
    %c0_i32_1 = arith.constant 0 : i32
    return %c0_i32, %c0_i32_0 : i32, i32
  }
  func.func @transform_5(%arg0: i32) -> (i32, i32) {
    %c0_i32 = arith.constant 0 : i32
    %c0_i32_0 = arith.constant 0 : i32
    %c0_i32_1 = arith.constant 0 : i32
    return %c0_i32, %c0_i32_0 : i32, i32
  }
  func.func @transform_6(%arg0: i32) -> (i32, i32) {
    %c0_i32 = arith.constant 0 : i32
    %c0_i32_0 = arith.constant 0 : i32
    %c0_i32_1 = arith.constant 0 : i32
    return %c0_i32, %c0_i32_0 : i32, i32
  }
  func.func @transform_7(%arg0: i32) -> (i32, i32) {
    %c0_i32 = arith.constant 0 : i32
    %c0_i32_0 = arith.constant 0 : i32
    %c0_i32_1 = arith.constant 0 : i32
    return %c0_i32, %c0_i32_0 : i32, i32
  }
  func.func @transform_8(%arg0: i32) -> (i32, i32) {
    %c0_i32 = arith.constant 0 : i32
    %c0_i32_0 = arith.constant 0 : i32
    %c0_i32_1 = arith.constant 0 : i32
    return %c0_i32, %c0_i32_0 : i32, i32
  }
  func.func @transform_9(%arg0: i32) -> (i32, i32) {
    %c0_i32 = arith.constant 0 : i32
    %c0_i32_0 = arith.constant 0 : i32
    return %arg0, %c0_i32 : i32, i32
  }
}

</mosaic_0001>

<bundles_post_ra>
// kernel: _lambda_.1
= control target key start
LH: loop header
LB: loop body
LE: loop exit
PB: predicated region body
PF: predicated region fallthrough
CT: control target
= control target key end

     0   :  { %s846_s11 = smov 0   ;;  %s904_s0 = inlined_call_operand.vmem [shape: f32[64,20], index: 0, kind: input, shape index: {}]   ;;  %s905_s1 = inlined_call_operand.vmem [shape: f32[64,12], index: 1, kind: input, shape index: {}]   ;;  %s906_s2 = inlined_call_operand.vmem [shape: bf16[20,32], index: 2, kind: input, shape index: {}]   ;;  %s907_s3 = inlined_call_operand.vmem [shape: bf16[12,32], index: 3, kind: input, shape index: {}]   ;;  %s908_s4 = inlined_call_operand.vmem [shape: f32[1,32], index: 4, kind: input, shape index: {}]   ;;  %s909_s5 = inlined_call_operand.vmem [shape: bf16[32,32], index: 5, kind: input, shape index: {}]   ;;  %s910_s6 = inlined_call_operand.vmem [shape: f32[1,32], index: 6, kind: input, shape index: {}]   ;;  %s911_s7 = inlined_call_operand.vmem [shape: bf16[32,1], index: 7, kind: input, shape index: {}]   ;;  %s912_s8 = inlined_call_operand.<no memory space> [shape: f32[1,1], index: 8, kind: input, shape index: {}]   ;;  %s913_s9 = inlined_call_operand.vmem [shape: f32[64,1], index: 9, kind: output, shape index: {}]  }
   0x1   :  { %14 = sst [smem:[#allocation2]] %s912_s8 }
   0x2 LB: > { %s699_s12 = sadd.s32 4294967295, %s789_s11   ;;  %p703_p0 = scmp.ge.s32.totalorder %s789_s11, 1  ;;  %s789_s11 = sphi %s846_s11, %s20_s11  }
   0x3   : > { %p300_p1 = scmp.lt.s32.totalorder %s789_s11, 5 }
   0x5   : > { %p301_p2 = pnand %p703_p0, %p300_p1 }
   0x6   : > { %v776_v0 = vld [vmem:[%s906_s2] sm:$0xff] (!%p301_p2)   ;;  %v791_v1 = vmov (!%p301_p2), 0.0   ;;  %vm380_vm0 = vcmask (!%p301_p2), 1045504   ;;  %v778_v3 = vld [vmem:[%s906_s2 + $0x8] ss:$0 sps:$4 sm:$0x33] (!%p301_p2)  }
   0x7   : > { %304 = sbr.rel (%p301_p2) target bundleno = 680 (0x2a8), region = 56  ;;  %742 = vmatprep.subr.bf16.mxu1 (!%p301_p2), %v791_v1  ;;  %736 = vmatprep.subr.bf16.mxu0 (!%p301_p2), %v791_v1  ;;  %v777_v2 = vld [vmem:[%s907_s3] sm:$0x3f] (!%p301_p2)   ;;  %vm438_vm1 = vcmask (!%p301_p2), 1041408   ;;  %s704_s18 = sshll.u32 (!%p301_p2), %s699_s12, 1  ;;  %vm792_vm2 = vmmov (!%p301_p2), 0  }
   0x8   : > { %743 = vmatpush3.bf16.msra.mxu1 (!%p301_p2), %v776_v0  ;;  %v382_v4 = vsel (!%p301_p2), %vm380_vm0, %v777_v2, 0  ;;  %v440_v5 = vsel (!%p301_p2), %vm438_vm1, %v778_v3, 0  ;;  %738 = vmatprep.mubr.msk.bf16.mxu0 (!%p301_p2), %vm792_vm2, %v791_v1  ;;  %p342_p3 = scmp.lt.s32.totalorder (!%p301_p2), %s704_s18, 7  ;;  %vm376_vm3 = vcmask (!%p301_p2), 97280   ;;  %vm434_vm4 = vcmask (!%p301_p2), 162816   ;;  %v779_v12 = vld [vmem:[%s909_s5] sm:$0xff] (!%p301_p2)  }
   0x9   : > { %744 = vmatprep.subr.bf16.mxu1 (!%p301_p2), %v791_v1  ;;  %737 = vmatpush3.bf16.msra.mxu0 (!%p301_p2), %v382_v4  ;;  %v780_v13 = vld [vmem:[%s909_s5 + $0x8] sm:$0xff] (!%p301_p2)   ;;  %v715_v16 = vld [vmem:[%s908_s4] ss:$0 sm:$0xff] (!%p301_p2)  ;;  %vm518_vm5 = vcmask (!%p301_p2), 261120   ;;  %s570_s17 = sld [smem:[#allocation2]] (!%p301_p2)  ;;  %vm628_vm6 = vcmask (!%p301_p2), 7168  }
   0xa   : > { %746 = vmatprep.mubr.msk.bf16.mxu1 (!%p301_p2), %vm792_vm2, %v791_v1  ;;  %750 = vmatprep.subr.bf16.mxu0 (!%p301_p2), %v791_v1  ;;  %v781_v30 = vld [vmem:[%s911_s7] sm:$0xff] (!%p301_p2)   ;;  %v782_v31 = vld [vmem:[%s911_s7 + $0x8] sm:$0xff] (!%p301_p2)  }
   0xb   : > { %v716_v32 = vld [vmem:[%s910_s6] ss:$0 sm:$0xff] (!%p301_p2) }
   0xc   : > { %745 = vmatpush3.bf16.msra.mxu1 (!%p301_p2), %v440_v5 }
   0xd   : > { %758 = vmatprep.subr.bf16.mxu1 (!%p301_p2), %v791_v1 }
   0xe   : > { %s915_s18 = smov (!%p342_p3, %s704_s18), 7 }
   0xf   : > { %s865_s19 = sshll.u32 %s915_s18, 3  ;;  %v571_v42 = vstv %s570_s17 }
  0x10   : > { %s351_s22 = scalar_lea.vmem %s905_s1, %s865_s19  ;;  %s345_s25 = scalar_lea.vmem %s904_s0, %s865_s19 }
  0x11   : > { %v363_v6 = vld [vmem:[%s351_s22] sm:$0xff]  ;;  %v364_v7 = vld [vmem:[%s351_s22 + $0x8] sm:$0xff]  ;;  %s357_s21 = scalar_lea.vmem %s913_s9, %s865_s19 }
  0x12   : > { %v360_v8 = vld [vmem:[%s345_s25] sm:$0xff]  ;;  %v365_v9 = vpack.c.bf16 %v364_v7, %v363_v6  ;;  %v361_v10 = vld [vmem:[%s345_s25 + $0x8] sm:$0xff] }
  0x13   : > { %v362_v11 = vpack.c.bf16 %v361_v10, %v360_v8 }
  0x14   : > { %739 = vmatmul.mubr.msk.bf16.vlgmr.msra.gmra.mrb[0].mxu0 %vm376_vm3, %v365_v9 }
  0x15   : > { %747 = vmatmul.mubr.msk.bf16.vlgmr.msra.gmra.mrb[0].mxu1 %vm434_vm4, %v362_v11  ;;  %754 = vmatprep.mubr.msk.bf16.mxu0 %vm792_vm2, %v791_v1 }
  0x16   : > { %762 = vmatprep.mubr.msk.bf16.mxu1 %vm792_vm2, %v791_v1  ;;  %751 = vmatpush3.bf16.msra.mxu0 %v779_v12 }
  0x17   : > { %752 = vmatprep.subr.bf16.mxu0 %v791_v1  ;;  %759 = vmatpush3.bf16.msra.mxu1 %v781_v30 }
  0x18   : > { %760 = vmatprep.subr.bf16.mxu1 %v791_v1 }
  0x1a   : > { %753 = vmatpush3.bf16.msra.mxu0 %v780_v13 }
  0x1b   : > { %761 = vmatpush3.bf16.msra.mxu1 %v782_v31 }
  0xe7   : > { %v418_v14 = vpop.f32.mrb[0].mxu0 }
  0xe8   : > { %v476_v15 = vpop.f32.mrb[0].mxu1  ;;  %v740_v17 = vpop.f32.mrb[1].mxu0 }
  0xe9   : > { %v477_v18 = vadd.f32 %v476_v15, %v418_v14  ;;  %v748_v19 = vpop.f32.mrb[1].mxu1  ;;  %v421_v20 = vpop.f32.mrb[2].mxu0 }
  0xea   : > { %v479_v21 = vpop.f32.mrb[2].mxu1  ;;  %v741_v22 = vpop.f32.mrb[3].mxu0 }
  0xeb   : > { %v490_v23 = vadd.f32 %v715_v16, %v477_v18  ;;  %v480_v24 = vadd.f32 %v479_v21, %v421_v20  ;;  %v749_v25 = vpop.f32.mrb[3].mxu1 }
  0xed   : > { %v491_v26 = vadd.f32 %v715_v16, %v480_v24  ;;  %v492_v27 = vmax.f32 %v490_v23, 0.0 }
  0xef   : > { %v493_v28 = vmax.f32 %v491_v26, 0.0 }
  0xf1   : > { %v494_v29 = vpack.c.bf16 %v493_v28, %v492_v27 }
  0xf3   : > { %755 = vmatmul.mubr.msk.bf16.vlgmr.msra.gmra.mrb[4].mxu0 %vm518_vm5, %v494_v29 }
 0x1c6   : > { %v556_v33 = vpop.f32.mrb[4].mxu0 }
 0x1c7   : > { %v557_v34 = vadd.f32 %v716_v32, %v556_v33  ;;  %v756_v35 = vpop.f32.mrb[5].mxu0 }
 0x1c8   : > { %v559_v36 = vpop.f32.mrb[6].mxu0 }
 0x1c9   : > { %v560_v37 = vadd.f32 %v716_v32, %v559_v36  ;;  %v757_v38 = vpop.f32.mrb[7].mxu0  ;;  %v563_v39 = vmax.f32 %v557_v34, 0.0 }
 0x1cb   : > { %v564_v40 = vmax.f32 %v560_v37, 0.0 }
 0x1cd   : > { %v565_v41 = vpack.c.bf16 %v564_v40, %v563_v39 }
 0x1cf   : > { %763 = vmatmul.mubr.msk.bf16.vlgmr.msra.gmra.mrb[4].mxu1 %vm518_vm5, %v565_v41 }
 0x2a2   : > { %v621_v43 = vpop.f32.mrb[4].mxu1 }
 0x2a3   : > { %v622_v44 = vadd.f32 %v621_v43, %v571_v42  ;;  %v764_v45 = vpop.f32.mrb[5].mxu1 }
 0x2a4   : > { %v624_v46 = vpop.f32.mrb[6].mxu1 }
 0x2a5   : > { %629 = vst.msk [vmem:[%s357_s21] sm:$0xff] %vm628_vm6, %v622_v44  ;;  %v625_v47 = vadd.f32 %v624_v46, %v571_v42  ;;  %v765_v48 = vpop.f32.mrb[7].mxu1 }
 0x2a7   : > { %630 = vst.msk [vmem:[%s357_s21 + $0x8] sm:$0xff] %vm628_vm6, %v625_v47 }
 0x2a8 PF: > { %s20_s11 = sadd.s32 1, %s789_s11  }
 0x2a9   : > { %p17_p4 = scmp.ge.s32.totalorder %s20_s11, 6  }
 0x2ab   :  { %19 = sbr.rel (!%p17_p4) target bundleno = 2 (0x2), region = 89 }

</bundles_post_ra>
